<compile_context>
chip_gen: v6e
topology: v6e:2x2x1
jax: 0.10.0
libtpu: 0.0.40
codegen_flags: <defaults>
</compile_context>

<pallas_src>
import jax
import jax.numpy as jnp
from jax.experimental import pallas as pl
from jax.experimental.pallas import tpu as pltpu


def _round_up(x, m):
    return ((x + m - 1) // m) * m


def tree_lstm_kernel(hl_ref, hr_ref, x_ref, cl_ref, cr_ref,
                     w1_ref, w2_ref, w0_ref, b_ref,
                     h_ref, c_ref, z_ref):
    """One (row-tile, K-chunk) step of the fused TreeLSTM cell.

    hl/hr/x:   (TM, KC)      activation K-chunks (cast to the MXU dtype here)
    cl/cr:     (TM, Upad)    cell states (gate math is f32)
    w1/w2/w0:  (KC, 5*Upad)  pre-padded weight K-chunks (MXU dtype)
    b:         (1, 5*Upad)   fused bias b1 + b2 + b0 (f32)
    h, c:      (TM, Upad)    lane-dense outputs, resident across the K axis
    z:         (TM, 5*Upad)  f32 pre-activation accumulator (VMEM scratch)
    """
    k = pl.program_id(1)
    nk = pl.num_programs(1)
    mxu_dtype = w1_ref.dtype

    part = (
        jnp.dot(hl_ref[...].astype(mxu_dtype), w1_ref[...],
                preferred_element_type=jnp.float32)
        + jnp.dot(hr_ref[...].astype(mxu_dtype), w2_ref[...],
                  preferred_element_type=jnp.float32)
        + jnp.dot(x_ref[...].astype(mxu_dtype), w0_ref[...],
                  preferred_element_type=jnp.float32))

    @pl.when(k == 0)
    def _():
        z_ref[...] = part

    @pl.when(k > 0)
    def _():
        z_ref[...] += part

    @pl.when(k == nk - 1)
    def _():
        upad = cl_ref.shape[1]
        z = z_ref[...] + b_ref[...]          # (1, 5*Upad) broadcast over rows
        a = z[:, 0:upad]
        # i, f1, f2, o sit in contiguous lanes -> one wide EUP sigmoid pass.
        # TODO(synk): on v5e, if z spills saturate the single vst slot at
        # large TM, consume z gate-by-gate instead of one wide slab.
        gates = jax.nn.sigmoid(z[:, upad:5 * upad])
        i_g = gates[:, 0 * upad:1 * upad]
        f1 = gates[:, 1 * upad:2 * upad]
        f2 = gates[:, 2 * upad:3 * upad]
        o = gates[:, 3 * upad:4 * upad]
        cl = cl_ref[...].astype(jnp.float32)
        cr = cr_ref[...].astype(jnp.float32)
        c = jnp.tanh(a) * i_g + f1 * cl + f2 * cr
        h = o * jnp.tanh(c)
        h_ref[...] = h.astype(h_ref.dtype)
        c_ref[...] = c.astype(c_ref.dtype)


def prepare_params(params, *, mxu_dtype=jnp.float32):
    """One-time weight packing (call once, reuse across every tree level).

    Pads each per-gate column block of W1/W2/W0 to Upad = round_up(U, 128) so
    gate g lives at lane columns [g*Upad, g*Upad + U), pads the K dim to Upad,
    casts to the MXU dtype, and fuses the three biases.  Weights are stored
    (in, out) so activations multiply as x @ W + b.
    """
    w1, b1 = params["FC1"]
    w2, b2 = params["FC2"]
    w0, b0 = params["FC0"]
    u = w1.shape[0]
    upad = _round_up(u, 128)

    def pad_w(w):
        if upad == u:
            return w.astype(mxu_dtype)
        w5 = jnp.pad(w.reshape(u, 5, u),
                     ((0, upad - u), (0, 0), (0, upad - u)))
        return w5.reshape(upad, 5 * upad).astype(mxu_dtype)

    b_sum = (b1.astype(jnp.float32) + b2.astype(jnp.float32)
             + b0.astype(jnp.float32)).reshape(5, u)
    b_fused = jnp.pad(b_sum, ((0, 0), (0, upad - u))).reshape(1, 5 * upad)

    return {"W1": pad_w(w1), "W2": pad_w(w2), "W0": pad_w(w0),
            "b": b_fused, "num_units": u, "upad": upad}


def tree_lstm_forward(left_in, right_in, input_x, prepped, *,
                      block_rows=512, weight_budget_bytes=20 << 20):
    """left_in = (h_l, c_l), right_in = (h_r, c_r), input_x: (N, U).

    `prepped` is the output of `prepare_params` (weights packed once).
    N nodes are tiled over a "parallel" row-grid axis; the contraction dim is
    tiled over an inner "arbitrary" K axis with an f32 accumulator scratch.
    """
    hl, cl = left_in
    hr, cr = right_in
    n, u = hl.shape
    assert u == prepped["num_units"]
    upad = prepped["upad"]
    out_dtype = hl.dtype

    # --- Row tiling: balanced tiles (minimal last-tile padding); force >=2
    # tiles whenever possible so "parallel" engages both v7x TensorCores.
    n8 = _round_up(max(n, 1), 8)
    g = pl.cdiv(n8, block_rows)
    if n8 >= 16:
        g = max(g, 2)
    tm = _round_up(pl.cdiv(n8, g), 8)
    npad = g * tm

    # --- K tiling: largest multiple-of-128 divisor of Upad whose
    # double-buffered weight chunks fit the per-step budget (bounds weight
    # residency on v7x's 64 MiB VMEM without repacking the weights).
    itm_w = jnp.dtype(prepped["W1"].dtype).itemsize
    m = upad // 128
    k_chunk = upad
    for d in range(m, 0, -1):
        if m % d:
            continue
        k_chunk = d * 128
        if 2 * 3 * k_chunk * 5 * upad * itm_w <= weight_budget_bytes:
            break
    num_k = upad // k_chunk

    # --- Pad activations only when actually required.
    def maybe_pad(x, rows, cols):
        pr, pc = rows - x.shape[0], cols - x.shape[1]
        if pr == 0 and pc == 0:
            return x
        return jnp.pad(x, ((0, pr), (0, pc)))

    hl_p = maybe_pad(hl, npad, upad)
    hr_p = maybe_pad(hr, npad, upad)
    x_p = maybe_pad(input_x, npad, upad)
    cl_p = maybe_pad(cl, npad, upad)
    cr_p = maybe_pad(cr, npad, upad)

    # --- VMEM limit from the actual footprint (double-buffered pipeline
    # blocks + f32 accumulator scratch) instead of the scoped default.
    itm_in = jnp.dtype(hl_p.dtype).itemsize
    itm_c = jnp.dtype(cl_p.dtype).itemsize
    itm_h = jnp.dtype(out_dtype).itemsize
    footprint = (
        2 * 3 * tm * k_chunk * itm_in          # h_l / h_r / x tiles
        + 2 * 2 * tm * upad * itm_c            # c_l / c_r tiles
        + 2 * 3 * k_chunk * 5 * upad * itm_w   # W1 / W2 / W0 chunks
        + 2 * 5 * upad * 4                     # fused bias
        + 2 * tm * upad * (itm_h + 4)          # h (out dtype) + c (f32) tiles
        + tm * 5 * upad * 4)                   # z accumulator scratch
    vmem_limit = int(min(2 * footprint + (4 << 20), 128 << 20))

    kchunk_spec = pl.BlockSpec((tm, k_chunk), lambda i, k: (i, k))
    cstate_spec = pl.BlockSpec((tm, upad), lambda i, k: (i, 0))
    w_spec = pl.BlockSpec((k_chunk, 5 * upad), lambda i, k: (k, 0))
    # NOTE: pl.Buffered(1) on the weight/bias specs would halve their VMEM
    # residency further when num_k == 1; the K-split already bounds it.

    h_pad, c_pad = pl.pallas_call(
        tree_lstm_kernel,
        out_shape=(jax.ShapeDtypeStruct((npad, upad), out_dtype),
                   jax.ShapeDtypeStruct((npad, upad), jnp.float32)),
        grid=(g, num_k),
        in_specs=[
            kchunk_spec,                                      # h_l
            kchunk_spec,                                      # h_r
            kchunk_spec,                                      # x
            cstate_spec,                                      # c_l
            cstate_spec,                                      # c_r
            w_spec,                                           # W1
            w_spec,                                           # W2
            w_spec,                                           # W0
            pl.BlockSpec((1, 5 * upad), lambda i, k: (0, 0)),  # fused bias
        ],
        out_specs=[cstate_spec,                               # h
                   cstate_spec],                              # c (f32)
        scratch_shapes=[pltpu.VMEM((tm, 5 * upad), jnp.float32)],
        compiler_params=pltpu.CompilerParams(
            dimension_semantics=("parallel", "arbitrary"),
            vmem_limit_bytes=vmem_limit),
    )(hl_p, hr_p, x_p, cl_p, cr_p,
      prepped["W1"], prepped["W2"], prepped["W0"], prepped["b"])

    if npad == n and upad == u:
        return h_pad, c_pad
    return h_pad[:n, :u], c_pad[:n, :u]


def init_params(key, num_units, dtype=jnp.float32):
    """Deterministic synthetic parameters matching nn.Linear(U, 5U) shapes.

    Weights are stored as (in, out) so activations multiply as x @ W + b.
    """
    keys = jax.random.split(key, 6)
    bound = 1.0 / jnp.sqrt(num_units)

    def linear(kw, kb):
        w = jax.random.uniform(kw, (num_units, 5 * num_units),
                               dtype, -bound, bound)
        b = jax.random.uniform(kb, (5 * num_units,), dtype, -bound, bound)
        return w, b

    return {
        "FC1": linear(keys[0], keys[1]),
        "FC2": linear(keys[2], keys[3]),
        "FC0": linear(keys[4], keys[5]),
    }


def tree_lstm_reference(left_in, right_in, input_x, params):
    """Pure-JAX reference for verification."""
    hl, cl = left_in
    hr, cr = right_in
    w1, b1 = params["FC1"]
    w2, b2 = params["FC2"]
    w0, b0 = params["FC0"]
    z = hl @ w1 + b1 + hr @ w2 + b2 + input_x @ w0 + b0
    u = hl.shape[1]
    a, i, f1, f2, o = [z[:, k * u:(k + 1) * u] for k in range(5)]
    sig = jax.nn.sigmoid
    c = jnp.tanh(a) * sig(i) + sig(f1) * cl + sig(f2) * cr
    h = sig(o) * jnp.tanh(c)
    return h, c


if __name__ == "__main__":
    B = 8          # nodes in this batch (one tree level)
    U = 32         # num_units (hidden)

    key = jax.random.PRNGKey(0)
    k_param, k_hl, k_cl, k_hr, k_cr, k_x = jax.random.split(key, 6)

    params = init_params(k_param, U)

    hl = jax.random.normal(k_hl, (B, U), jnp.float32)
    cl = jax.random.normal(k_cl, (B, U), jnp.float32)
    hr = jax.random.normal(k_hr, (B, U), jnp.float32)
    cr = jax.random.normal(k_cr, (B, U), jnp.float32)
    x = jax.random.normal(k_x, (B, U), jnp.float32)

    h_ref, c_ref = tree_lstm_reference((hl, cl), (hr, cr), x, params)

    # f32 MXU path.
    prepped_f32 = prepare_params(params, mxu_dtype=jnp.float32)
    h, c = tree_lstm_forward((hl, cl), (hr, cr), x, prepped_f32)
    jax.block_until_ready((h, c))
    assert h.shape == (B, U) and c.shape == (B, U)
    assert jnp.allclose(h, h_ref, atol=2e-4, rtol=2e-4)
    assert jnp.allclose(c, c_ref, atol=2e-4, rtol=2e-4)

    # bf16 MXU path (recommended on v6e / v7x): weights pre-cast once at prep
    # time, activations cast in-kernel, accumulation and gate math stay f32.
    prepped_bf16 = prepare_params(params, mxu_dtype=jnp.bfloat16)
    h16, c16 = tree_lstm_forward((hl, cl), (hr, cr), x, prepped_bf16)
    jax.block_until_ready((h16, c16))
    assert jnp.allclose(h16, h_ref, atol=5e-2, rtol=5e-2)
    assert jnp.allclose(c16, c_ref, atol=5e-2, rtol=5e-2)

    print("KERNEL_OK")
</pallas_src>

<mosaic_0001>
module attributes {stable_mosaic.version = 11 : i64} {
  func.func @tree_lstm_kernel(%arg0: i32, %arg1: i32, %arg2: memref<8x128xf32, #tpu.memory_space<vmem>>, %arg3: memref<8x128xf32, #tpu.memory_space<vmem>>, %arg4: memref<8x128xf32, #tpu.memory_space<vmem>>, %arg5: memref<8x128xf32, #tpu.memory_space<vmem>>, %arg6: memref<8x128xf32, #tpu.memory_space<vmem>>, %arg7: memref<128x640xf32, #tpu.memory_space<vmem>>, %arg8: memref<128x640xf32, #tpu.memory_space<vmem>>, %arg9: memref<128x640xf32, #tpu.memory_space<vmem>>, %arg10: memref<1x640xf32, #tpu.memory_space<vmem>>, %arg11: memref<8x128xf32, #tpu.memory_space<vmem>>, %arg12: memref<8x128xf32, #tpu.memory_space<vmem>>, %arg13: memref<8x640xf32, #tpu.memory_space<vmem>>) attributes {dimension_semantics = [#tpu.dimension_semantics<parallel>, #tpu.dimension_semantics<arbitrary>], iteration_bounds = array<i64: 1, 1>, scalar_prefetch = 0 : i64, scratch_operands = 1 : i64, tpu.core_type = #tpu.core_type<tc>, window_params = [{transform_indices = @transform_0, window_bounds = array<i64: 8, 128>}, {transform_indices = @transform_1, window_bounds = array<i64: 8, 128>}, {transform_indices = @transform_2, window_bounds = array<i64: 8, 128>}, {transform_indices = @transform_3, window_bounds = array<i64: 8, 128>}, {transform_indices = @transform_4, window_bounds = array<i64: 8, 128>}, {transform_indices = @transform_5, window_bounds = array<i64: 128, 640>}, {transform_indices = @transform_6, window_bounds = array<i64: 128, 640>}, {transform_indices = @transform_7, window_bounds = array<i64: 128, 640>}, {pipeline_mode = #tpu.pipeline_mode<synchronous>, transform_indices = @transform_8, window_bounds = array<i64: 1, 640>}, {transform_indices = @transform_9, window_bounds = array<i64: 8, 128>}, {transform_indices = @transform_10, window_bounds = array<i64: 8, 128>}]} {
    %c0 = arith.constant 0 : index
    %c0_0 = arith.constant 0 : index
    %0 = vector.load %arg2[%c0, %c0_0] : memref<8x128xf32, #tpu.memory_space<vmem>>, vector<8x128xf32>
    %c0_1 = arith.constant 0 : index
    %c0_2 = arith.constant 0 : index
    %1 = vector.load %arg7[%c0_1, %c0_2] : memref<128x640xf32, #tpu.memory_space<vmem>>, vector<128x640xf32>
    %cst = arith.constant dense<0.000000e+00> : vector<8x640xf32>
    %2 = tpu.matmul %0, %1, %cst {dimension_numbers = #tpu.dot_dimension_numbers<[1], [0], [0], [1], [0, 0, 1, 1], [], []>} : vector<8x128xf32>, vector<128x640xf32>, vector<8x640xf32> -> vector<8x640xf32>
    %c0_3 = arith.constant 0 : index
    %c0_4 = arith.constant 0 : index
    %3 = vector.load %arg3[%c0_3, %c0_4] : memref<8x128xf32, #tpu.memory_space<vmem>>, vector<8x128xf32>
    %c0_5 = arith.constant 0 : index
    %c0_6 = arith.constant 0 : index
    %4 = vector.load %arg8[%c0_5, %c0_6] : memref<128x640xf32, #tpu.memory_space<vmem>>, vector<128x640xf32>
    %cst_7 = arith.constant dense<0.000000e+00> : vector<8x640xf32>
    %5 = tpu.matmul %3, %4, %cst_7 {dimension_numbers = #tpu.dot_dimension_numbers<[1], [0], [0], [1], [0, 0, 1, 1], [], []>} : vector<8x128xf32>, vector<128x640xf32>, vector<8x640xf32> -> vector<8x640xf32>
    %6 = arith.addf %2, %5 : vector<8x640xf32>
    %c0_8 = arith.constant 0 : index
    %c0_9 = arith.constant 0 : index
    %7 = vector.load %arg4[%c0_8, %c0_9] : memref<8x128xf32, #tpu.memory_space<vmem>>, vector<8x128xf32>
    %c0_10 = arith.constant 0 : index
    %c0_11 = arith.constant 0 : index
    %8 = vector.load %arg9[%c0_10, %c0_11] : memref<128x640xf32, #tpu.memory_space<vmem>>, vector<128x640xf32>
    %cst_12 = arith.constant dense<0.000000e+00> : vector<8x640xf32>
    %9 = tpu.matmul %7, %8, %cst_12 {dimension_numbers = #tpu.dot_dimension_numbers<[1], [0], [0], [1], [0, 0, 1, 1], [], []>} : vector<8x128xf32>, vector<128x640xf32>, vector<8x640xf32> -> vector<8x640xf32>
    %10 = arith.addf %6, %9 : vector<8x640xf32>
    %c0_i32 = arith.constant 0 : i32
    %11 = arith.cmpi eq, %arg1, %c0_i32 : i32
    %12 = arith.extui %11 : i1 to i32
    %c0_i32_13 = arith.constant 0 : i32
    %13 = arith.cmpi ne, %12, %c0_i32_13 : i32
    scf.if %13 {
      %c0_18 = arith.constant 0 : index
      %c0_19 = arith.constant 0 : index
      %20 = vector.load %arg13[%c0_18, %c0_19] : memref<8x640xf32, #tpu.memory_space<vmem>>, vector<8x640xf32>
      tpu.vector_store %arg13[%c0_18, %c0_19], %10 {strides = array<i32>} : memref<8x640xf32, #tpu.memory_space<vmem>>, vector<8x640xf32>,
    } else {
    }
    %c0_i32_14 = arith.constant 0 : i32
    %14 = arith.cmpi sgt, %arg1, %c0_i32_14 : i32
    %15 = arith.extui %14 : i1 to i32
    %c0_i32_15 = arith.constant 0 : i32
    %16 = arith.cmpi ne, %15, %c0_i32_15 : i32
    scf.if %16 {
      %c0_18 = arith.constant 0 : index
      %c0_19 = arith.constant 0 : index
      %20 = vector.load %arg13[%c0_18, %c0_19] : memref<8x640xf32, #tpu.memory_space<vmem>>, vector<8x640xf32>
      %21 = arith.addf %20, %10 : vector<8x640xf32>
      %c0_20 = arith.constant 0 : index
      %c0_21 = arith.constant 0 : index
      %22 = vector.load %arg13[%c0_20, %c0_21] : memref<8x640xf32, #tpu.memory_space<vmem>>, vector<8x640xf32>
      tpu.vector_store %arg13[%c0_20, %c0_21], %21 {strides = array<i32>} : memref<8x640xf32, #tpu.memory_space<vmem>>, vector<8x640xf32>,
    } else {
    }
    %c0_i32_16 = arith.constant 0 : i32
    %17 = arith.cmpi eq, %arg1, %c0_i32_16 : i32
    %18 = arith.extui %17 : i1 to i32
    %c0_i32_17 = arith.constant 0 : i32
    %19 = arith.cmpi ne, %18, %c0_i32_17 : i32
    scf.if %19 {
      %c0_18 = arith.constant 0 : index
      %c0_19 = arith.constant 0 : index
      %20 = vector.load %arg13[%c0_18, %c0_19] : memref<8x640xf32, #tpu.memory_space<vmem>>, vector<8x640xf32>
      %c0_20 = arith.constant 0 : index
      %c0_21 = arith.constant 0 : index
      %21 = vector.load %arg10[%c0_20, %c0_21] : memref<1x640xf32, #tpu.memory_space<vmem>>, vector<1x640xf32>
      %22 = vector.broadcast %21 : vector<1x640xf32> to vector<8x640xf32>
      %23 = arith.addf %20, %22 : vector<8x640xf32>
      %24 = vector.extract_strided_slice %23 {offsets = [0, 0], sizes = [8, 128], strides = [1, 1]} : vector<8x640xf32> to vector<8x128xf32>
      %25 = vector.extract_strided_slice %23 {offsets = [0, 128], sizes = [8, 512], strides = [1, 1]} : vector<8x640xf32> to vector<8x512xf32>
      %26 = arith.negf %25 : vector<8x512xf32>
      %27 = math.exp %26 : vector<8x512xf32>
      %cst_22 = arith.constant 1.000000e+00 : f32
      %28 = vector.broadcast %cst_22 : f32 to vector<8x512xf32>
      %29 = arith.addf %28, %27 : vector<8x512xf32>
      %30 = arith.divf %28, %29 : vector<8x512xf32>
      %31 = vector.extract_strided_slice %30 {offsets = [0, 0], sizes = [8, 128], strides = [1, 1]} : vector<8x512xf32> to vector<8x128xf32>
      %32 = vector.extract_strided_slice %30 {offsets = [0, 128], sizes = [8, 128], strides = [1, 1]} : vector<8x512xf32> to vector<8x128xf32>
      %33 = vector.extract_strided_slice %30 {offsets = [0, 256], sizes = [8, 128], strides = [1, 1]} : vector<8x512xf32> to vector<8x128xf32>
      %34 = vector.extract_strided_slice %30 {offsets = [0, 384], sizes = [8, 128], strides = [1, 1]} : vector<8x512xf32> to vector<8x128xf32>
      %c0_23 = arith.constant 0 : index
      %c0_24 = arith.constant 0 : index
      %35 = vector.load %arg5[%c0_23, %c0_24] : memref<8x128xf32, #tpu.memory_space<vmem>>, vector<8x128xf32>
      %c0_25 = arith.constant 0 : index
      %c0_26 = arith.constant 0 : index
      %36 = vector.load %arg6[%c0_25, %c0_26] : memref<8x128xf32, #tpu.memory_space<vmem>>, vector<8x128xf32>
      %37 = math.tanh %24 : vector<8x128xf32>
      %38 = arith.mulf %37, %31 : vector<8x128xf32>
      %39 = arith.mulf %32, %35 : vector<8x128xf32>
      %40 = arith.addf %38, %39 : vector<8x128xf32>
      %41 = arith.mulf %33, %36 : vector<8x128xf32>
      %42 = arith.addf %40, %41 : vector<8x128xf32>
      %43 = math.tanh %42 : vector<8x128xf32>
      %44 = arith.mulf %34, %43 : vector<8x128xf32>
      %c0_27 = arith.constant 0 : index
      %c0_28 = arith.constant 0 : index
      %45 = vector.load %arg11[%c0_27, %c0_28] : memref<8x128xf32, #tpu.memory_space<vmem>>, vector<8x128xf32>
      tpu.vector_store %arg11[%c0_27, %c0_28], %44 {strides = array<i32>} : memref<8x128xf32, #tpu.memory_space<vmem>>, vector<8x128xf32>,
      %c0_29 = arith.constant 0 : index
      %c0_30 = arith.constant 0 : index
      %46 = vector.load %arg12[%c0_29, %c0_30] : memref<8x128xf32, #tpu.memory_space<vmem>>, vector<8x128xf32>
      tpu.vector_store %arg12[%c0_29, %c0_30], %42 {strides = array<i32>} : memref<8x128xf32, #tpu.memory_space<vmem>>, vector<8x128xf32>,
    } else {
    }
    return
  }
  func.func @transform_0(%arg0: i32, %arg1: i32) -> (i32, i32) {
    %c0_i32 = arith.constant 0 : i32
    return %arg0, %arg1 : i32, i32
  }
  func.func @transform_1(%arg0: i32, %arg1: i32) -> (i32, i32) {
    %c0_i32 = arith.constant 0 : i32
    return %arg0, %arg1 : i32, i32
  }
  func.func @transform_2(%arg0: i32, %arg1: i32) -> (i32, i32) {
    %c0_i32 = arith.constant 0 : i32
    return %arg0, %arg1 : i32, i32
  }
  func.func @transform_3(%arg0: i32, %arg1: i32) -> (i32, i32) {
    %c0_i32 = arith.constant 0 : i32
    %c0_i32_0 = arith.constant 0 : i32
    return %arg0, %c0_i32 : i32, i32
  }
  func.func @transform_4(%arg0: i32, %arg1: i32) -> (i32, i32) {
    %c0_i32 = arith.constant 0 : i32
    %c0_i32_0 = arith.constant 0 : i32
    return %arg0, %c0_i32 : i32, i32
  }
  func.func @transform_5(%arg0: i32, %arg1: i32) -> (i32, i32) {
    %c0_i32 = arith.constant 0 : i32
    %c0_i32_0 = arith.constant 0 : i32
    return %arg1, %c0_i32 : i32, i32
  }
  func.func @transform_6(%arg0: i32, %arg1: i32) -> (i32, i32) {
    %c0_i32 = arith.constant 0 : i32
    %c0_i32_0 = arith.constant 0 : i32
    return %arg1, %c0_i32 : i32, i32
  }
  func.func @transform_7(%arg0: i32, %arg1: i32) -> (i32, i32) {
    %c0_i32 = arith.constant 0 : i32
    %c0_i32_0 = arith.constant 0 : i32
    return %arg1, %c0_i32 : i32, i32
  }
  func.func @transform_8(%arg0: i32, %arg1: i32) -> (i32, i32) {
    %c0_i32 = arith.constant 0 : i32
    %c0_i32_0 = arith.constant 0 : i32
    %c0_i32_1 = arith.constant 0 : i32
    return %c0_i32, %c0_i32_0 : i32, i32
  }
  func.func @transform_9(%arg0: i32, %arg1: i32) -> (i32, i32) {
    %c0_i32 = arith.constant 0 : i32
    %c0_i32_0 = arith.constant 0 : i32
    return %arg0, %c0_i32 : i32, i32
  }
  func.func @transform_10(%arg0: i32, %arg1: i32) -> (i32, i32) {
    %c0_i32 = arith.constant 0 : i32
    %c0_i32_0 = arith.constant 0 : i32
    return %arg0, %c0_i32 : i32, i32
  }
}

</mosaic_0001>

<bundles_post_ra>
// kernel: tpu_custom_call.1
= control target key start
LH: loop header
LB: loop body
LE: loop exit
PB: predicated region body
PF: predicated region fallthrough
CT: control target
= control target key end

     0   :  { %16 = vsyncpa [#allocation4], 0  ;;  %s1745_s0 = inlined_call_operand.hbm [shape: f32[8,128], index: 0, kind: input, shape index: {}]   ;;  %s1746_s1 = inlined_call_operand.hbm [shape: f32[8,128], index: 1, kind: input, shape index: {}]   ;;  %s1747_s2 = inlined_call_operand.hbm [shape: f32[8,128], index: 2, kind: input, shape index: {}]   ;;  %s1748_s3 = inlined_call_operand.hbm [shape: f32[8,128], index: 3, kind: input, shape index: {}]   ;;  %s1749_s4 = inlined_call_operand.hbm [shape: f32[8,128], index: 4, kind: input, shape index: {}]   ;;  %s1750_s5 = inlined_call_operand.hbm [shape: f32[128,640], index: 5, kind: input, shape index: {}]   ;;  %s1751_s6 = inlined_call_operand.hbm [shape: f32[128,640], index: 6, kind: input, shape index: {}]   ;;  %s1752_s7 = inlined_call_operand.hbm [shape: f32[128,640], index: 7, kind: input, shape index: {}]   ;;  %s1753_s8 = inlined_call_operand.vmem [shape: f32[1,640], index: 8, kind: input, shape index: {}]   ;;  %s1754_s9 = inlined_call_operand.hbm [shape: f32[8,128], index: 9, kind: output, shape index: {0}]   ;;  %s1755_s10 = inlined_call_operand.hbm [shape: f32[8,128], index: 10, kind: output, shape index: {1}]  }
   0x1   :  { %17 = vsyncpa [#allocation7], 0 }
   0x2   :  { %18 = vsyncpa [#allocation10], 0 }
   0x3   :  { %19 = vsyncpa [#allocation13], 0 }
   0x4   :  { %20 = vsyncpa [#allocation16], 0 }
   0x5   :  { %21 = vsyncpa [#allocation5], 0 }
   0x6   :  { %22 = vsyncpa [#allocation19], 0  ;;  %s1564_s13 = smov [#allocation6]   ;;  %s1565_s15 = smov [#allocation9]  }
   0x7   :  { %s39_s14 = sshll.u32 %s1564_s13, 4  ;;  %s59_s16 = sshll.u32 %s1565_s15, 4  ;;  %s40_s14 = int_to_ptr.vmem [resolvable:$true] %s39_s14  ;;  %s60_s16 = int_to_ptr.vmem [resolvable:$true] %s59_s16 }
   0x8   :  { %s1358_s17 = scalar_lea.vmem %s40_s14, 128  ;;  %p1363_p1 = scmp.lt.s32.totalorder %s40_s14, %s40_s14 }
   0x9   :  { %p1359_p0 = scmp.ne.s32.totalorder %s40_s14, %s1358_s17  ;;  %p1364_p2 = scmp.lt.s32.totalorder %s1358_s17, %s1358_s17 }
   0xb   :  { %p1365_p3 = por %p1364_p2, %p1363_p1 }
   0xd   :  { %p1366_p4 = pnand %p1365_p3, %p1359_p0 }
   0xf   :  { %1369 = shalt.err (!%p1366_p4)
}
  0x10   :  { %42 = dma.hbm_to_vmem [thread:$0]  %s1746_s1, 128, %s40_s14, [#allocation7]  }
  0x11   :  { %s1378_s20 = scalar_lea.vmem %s60_s16, 128  ;;  %p1383_p6 = scmp.lt.s32.totalorder %s60_s16, %s60_s16 }
  0x12   :  { %p1379_p5 = scmp.ne.s32.totalorder %s60_s16, %s1378_s20  ;;  %p1384_p7 = scmp.lt.s32.totalorder %s1378_s20, %s1378_s20 }
  0x14   :  { %p1385_p8 = por %p1384_p7, %p1383_p6 }
  0x16   :  { %p1386_p9 = pnand %p1385_p8, %p1379_p5 }
  0x18   :  { %1389 = shalt.err (!%p1386_p9)
}
  0x19   :  { %62 = dma.hbm_to_vmem [thread:$0]  %s1748_s3, 128, %s60_s16, [#allocation10]  }
  0x1a   :  { %s1566_s23 = smov [#allocation12]  }
  0x1b   :  { %s78_s24 = sshll.u32 %s1566_s23, 4  ;;  %s79_s24 = int_to_ptr.vmem [resolvable:$true] %s78_s24 }
  0x1c   :  { %s1398_s25 = scalar_lea.vmem %s79_s24, 10240  ;;  %p1403_p11 = scmp.lt.s32.totalorder %s79_s24, %s79_s24 }
  0x1d   :  { %p1399_p10 = scmp.ne.s32.totalorder %s79_s24, %s1398_s25  ;;  %p1404_p12 = scmp.lt.s32.totalorder %s1398_s25, %s1398_s25 }
  0x1f   :  { %p1405_p13 = por %p1404_p12, %p1403_p11 }
  0x21   :  { %p1406_p0 = pnand %p1405_p13, %p1399_p10 }
  0x23   :  { %1409 = shalt.err (!%p1406_p0)
}
  0x24   :  { %s1567_s1 = smov 640   ;;  %s1568_s26 = smov 40  }
  0x25   :  { %84 = dma.hbm_to_vmem [thread:$0]  %s1750_s5, 10240, %s79_s24, [#allocation13], %s1567_s1, %s1567_s1, %s1568_s26  }
  0x26   :  { %s1569_s3 = smov [#allocation3]   ;;  %s1570_s30 = smov [#allocation8]  }
  0x27   :  { %s29_s29 = sshll.u32 %s1569_s3, 4  ;;  %s49_s11 = sshll.u32 %s1570_s30, 4  ;;  %s30_s29 = int_to_ptr.vmem [resolvable:$true] %s29_s29  ;;  %s50_s11 = int_to_ptr.vmem [resolvable:$true] %s49_s11 }
  0x28   :  { %s1418_s12 = scalar_lea.vmem %s30_s29, 128  ;;  %p1423_p2 = scmp.lt.s32.totalorder %s30_s29, %s30_s29 }
  0x29   :  { %p1419_p1 = scmp.ne.s32.totalorder %s30_s29, %s1418_s12  ;;  %p1424_p3 = scmp.lt.s32.totalorder %s1418_s12, %s1418_s12 }
  0x2b   :  { %p1425_p4 = por %p1424_p3, %p1423_p2 }
  0x2d   :  { %p1426_p5 = pnand %p1425_p4, %p1419_p1 }
  0x2f   :  { %1429 = shalt.err (!%p1426_p5)
}
  0x30   :  { %32 = dma.hbm_to_vmem [thread:$0]  %s1745_s0, 128, %s30_s29, [#allocation4]  }
  0x31   :  { %s1438_s15 = scalar_lea.vmem %s50_s11, 128  ;;  %p1443_p7 = scmp.lt.s32.totalorder %s50_s11, %s50_s11 }
  0x32   :  { %p1439_p6 = scmp.ne.s32.totalorder %s50_s11, %s1438_s15  ;;  %p1444_p8 = scmp.lt.s32.totalorder %s1438_s15, %s1438_s15 }
  0x34   :  { %p1445_p9 = por %p1444_p8, %p1443_p7 }
  0x36   :  { %p1446_p10 = pnand %p1445_p9, %p1439_p6 }
  0x38   :  { %1449 = shalt.err (!%p1446_p10)
}
  0x39   :  { %52 = dma.hbm_to_vmem [thread:$0]  %s1747_s2, 128, %s50_s11, [#allocation7]  }
  0x3a   :  { %s1571_s17 = smov [#allocation11]   ;;  %s1572_s19 = smov [#allocation14]  }
  0x3b   :  { %s69_s18 = sshll.u32 %s1571_s17, 4  ;;  %s90_s20 = sshll.u32 %s1572_s19, 4  ;;  %s70_s18 = int_to_ptr.vmem [resolvable:$true] %s69_s18  ;;  %s91_s20 = int_to_ptr.vmem [resolvable:$true] %s90_s20 }
  0x3c   :  { %s1458_s21 = scalar_lea.vmem %s70_s18, 128  ;;  %p1463_p12 = scmp.lt.s32.totalorder %s70_s18, %s70_s18 }
  0x3d   :  { %p1459_p11 = scmp.ne.s32.totalorder %s70_s18, %s1458_s21  ;;  %p1464_p13 = scmp.lt.s32.totalorder %s1458_s21, %s1458_s21 }
  0x3f   :  { %p1465_p0 = por %p1464_p13, %p1463_p12 }
  0x41   :  { %p1466_p1 = pnand %p1465_p0, %p1459_p11 }
  0x43   :  { %1469 = shalt.err (!%p1466_p1)
}
  0x44   :  { %72 = dma.hbm_to_vmem [thread:$0]  %s1749_s4, 128, %s70_s18, [#allocation10]  }
  0x45   :  { %s1478_s23 = scalar_lea.vmem %s91_s20, 10240  ;;  %p1483_p3 = scmp.lt.s32.totalorder %s91_s20, %s91_s20 }
  0x46   :  { %p1479_p2 = scmp.ne.s32.totalorder %s91_s20, %s1478_s23  ;;  %p1484_p4 = scmp.lt.s32.totalorder %s1478_s23, %s1478_s23 }
  0x48   :  { %p1485_p5 = por %p1484_p4, %p1483_p3 }
  0x4a   :  { %p1486_p6 = pnand %p1485_p5, %p1479_p2 }
  0x4c   :  { %1489 = shalt.err (!%p1486_p6)
}
  0x4d   :  { %96 = dma.hbm_to_vmem [thread:$0]  %s1751_s6, 10240, %s91_s20, [#allocation13], %s1567_s1, %s1567_s1, %s1568_s26  }
  0x4e   :  { %s1573_s25 = smov [#allocation15]  }
  0x4f   :  { %s102_s27 = sshll.u32 %s1573_s25, 4  ;;  %s103_s27 = int_to_ptr.vmem [resolvable:$true] %s102_s27 }
  0x50   :  { %s1498_s28 = scalar_lea.vmem %s103_s27, 10240  ;;  %p1503_p8 = scmp.lt.s32.totalorder %s103_s27, %s103_s27 }
  0x51   :  { %p1499_p7 = scmp.ne.s32.totalorder %s103_s27, %s1498_s28  ;;  %p1504_p9 = scmp.lt.s32.totalorder %s1498_s28, %s1498_s28 }
  0x53   :  { %p1505_p10 = por %p1504_p9, %p1503_p8 }
  0x55   :  { %p1506_p11 = pnand %p1505_p10, %p1499_p7 }
  0x57   :  { %1509 = shalt.err (!%p1506_p11)
}
  0x58   :  { %108 = dma.hbm_to_vmem [thread:$0]  %s1752_s7, 10240, %s103_s27, [#allocation16], %s1567_s1, %s1567_s1, %s1568_s26  }
  0x59   :  { %1550 = dma.done.wait [#allocation4], 128  }
  0x5a   :  { %1551 = vsyncadd [#allocation4], 4294967168 }
  0x5b   :  { %1552 = dma.done.wait [#allocation7], 256  }
  0x5c   :  { %1553 = vsyncadd [#allocation7], 4294967040 }
  0x5d   :  { %1554 = dma.done.wait [#allocation10], 256  }
  0x5e   :  { %1555 = vsyncadd [#allocation10], 4294967040 }
  0x5f   :  { %1556 = dma.done.wait [#allocation13], 20480  }
  0x60   :  { %1557 = vsyncadd [#allocation13], 4294946816 }
  0x61   :  { %1558 = dma.done.wait [#allocation16], 10240  }
  0x62   :  { %1559 = vsyncadd [#allocation16], 4294957056  ;;  %v1574_v0 = vmov 0.0   ;;  %v293_v1 = vld [vmem:[#allocation14 + $0x260] sm:$0xff]  ;;  %v295_v2 = vld [vmem:[#allocation14 + $0x270] sm:$0xff]  ;;  %vm1575_vm0 = vmmov 0  }
  0x63   :  { %361 = vmatprep.mubr.f32.mxu0 %v1574_v0  ;;  %432 = vmatprep.mubr.f32.mxu1 %v1574_v0  ;;  %v292_v3 = vld [vmem:[#allocation14 + $0x258] sm:$0xff]  ;;  %v294_v4 = vld [vmem:[#allocation14 + $0x268] sm:$0xff]  ;;  %v287_v7 = vld [vmem:[#allocation14 + $0x230] sm:$0xff] }
  0x64   :  { %297 = vmatprep.subr.mxu0 %v293_v1  ;;  %368 = vmatprep.subr.mxu1 %v295_v2  ;;  %v288_v5 = vld [vmem:[#allocation14 + $0x238] sm:$0xff]  ;;  %v290_v6 = vld [vmem:[#allocation14 + $0x248] sm:$0xff]  ;;  %v289_v8 = vld [vmem:[#allocation14 + $0x240] sm:$0xff] }
  0x65   :  { %298 = vmatpush1.msra.mxu0 %v292_v3  ;;  %369 = vmatpush1.msra.mxu1 %v294_v4  ;;  %v283_v9 = vld [vmem:[#allocation14 + $0x210] sm:$0xff]  ;;  %v285_v10 = vld [vmem:[#allocation14 + $0x220] sm:$0xff]  ;;  %v282_v11 = vld [vmem:[#allocation14 + $0x208] sm:$0xff] }
  0x66   :  { %299 = vmatprep.subr.mxu0 %v288_v5  ;;  %370 = vmatprep.subr.mxu1 %v290_v6  ;;  %v284_v12 = vld [vmem:[#allocation14 + $0x218] sm:$0xff]  ;;  %v278_v13 = vld [vmem:[#allocation14 + $0x1e8] sm:$0xff]  ;;  %v277_v15 = vld [vmem:[#allocation14 + $0x1e0] sm:$0xff] }
  0x67   :  { %300 = vmatpush1.msra.mxu0 %v287_v7  ;;  %371 = vmatpush1.msra.mxu1 %v289_v8  ;;  %v280_v14 = vld [vmem:[#allocation14 + $0x1f8] sm:$0xff]  ;;  %v279_v16 = vld [vmem:[#allocation14 + $0x1f0] sm:$0xff]  ;;  %v273_v17 = vld [vmem:[#allocation14 + $0x1c0] sm:$0xff] }
  0x68   :  { %301 = vmatprep.subr.mxu0 %v283_v9  ;;  %372 = vmatprep.subr.mxu1 %v285_v10  ;;  %v275_v18 = vld [vmem:[#allocation14 + $0x1d0] sm:$0xff]  ;;  %v272_v19 = vld [vmem:[#allocation14 + $0x1b8] sm:$0xff]  ;;  %v274_v20 = vld [vmem:[#allocation14 + $0x1c8] sm:$0xff] }
  0x69   :  { %302 = vmatpush1.msra.mxu0 %v282_v11  ;;  %373 = vmatpush1.msra.mxu1 %v284_v12  ;;  %v268_v21 = vld [vmem:[#allocation14 + $0x198] sm:$0xff]  ;;  %v270_v22 = vld [vmem:[#allocation14 + $0x1a8] sm:$0xff]  ;;  %v267_v23 = vld [vmem:[#allocation14 + $0x190] sm:$0xff] }
  0x6a   :  { %303 = vmatprep.subr.mxu0 %v278_v13  ;;  %374 = vmatprep.subr.mxu1 %v280_v14  ;;  %v269_v24 = vld [vmem:[#allocation14 + $0x1a0] sm:$0xff]  ;;  %v263_v25 = vld [vmem:[#allocation14 + $0x170] sm:$0xff]  ;;  %v262_v27 = vld [vmem:[#allocation14 + $0x168] sm:$0xff] }
  0x6b   :  { %304 = vmatpush1.msra.mxu0 %v277_v15  ;;  %375 = vmatpush1.msra.mxu1 %v279_v16  ;;  %v265_v26 = vld [vmem:[#allocation14 + $0x180] sm:$0xff]  ;;  %v264_v28 = vld [vmem:[#allocation14 + $0x178] sm:$0xff]  ;;  %v258_v29 = vld [vmem:[#allocation14 + $0x148] sm:$0xff] }
  0x6c   :  { %305 = vmatprep.subr.mxu0 %v273_v17  ;;  %376 = vmatprep.subr.mxu1 %v275_v18  ;;  %v260_v30 = vld [vmem:[#allocation14 + $0x158] sm:$0xff]  ;;  %v257_v31 = vld [vmem:[#allocation14 + $0x140] sm:$0xff]  ;;  %v259_v32 = vld [vmem:[#allocation14 + $0x150] sm:$0xff] }
  0x6d   :  { %306 = vmatpush1.msra.mxu0 %v272_v19  ;;  %377 = vmatpush1.msra.mxu1 %v274_v20  ;;  %v253_v33 = vld [vmem:[#allocation14 + $0x120] sm:$0xff]  ;;  %v255_v34 = vld [vmem:[#allocation14 + $0x130] sm:$0xff]  ;;  %v252_v35 = vld [vmem:[#allocation14 + $0x118] sm:$0xff] }
  0x6e   :  { %307 = vmatprep.subr.mxu0 %v268_v21  ;;  %378 = vmatprep.subr.mxu1 %v270_v22  ;;  %v254_v36 = vld [vmem:[#allocation14 + $0x128] sm:$0xff]  ;;  %v248_v37 = vld [vmem:[#allocation14 + $0xf8] sm:$0xff]  ;;  %v247_v39 = vld [vmem:[#allocation14 + $0xf0] sm:$0xff] }
  0x6f   :  { %308 = vmatpush1.msra.mxu0 %v267_v23  ;;  %379 = vmatpush1.msra.mxu1 %v269_v24  ;;  %v250_v38 = vld [vmem:[#allocation14 + $0x108] sm:$0xff]  ;;  %v249_v40 = vld [vmem:[#allocation14 + $0x100] sm:$0xff]  ;;  %v243_v41 = vld [vmem:[#allocation14 + $0xd0] sm:$0xff] }
  0x70   :  { %309 = vmatprep.subr.mxu0 %v263_v25  ;;  %380 = vmatprep.subr.mxu1 %v265_v26  ;;  %v245_v42 = vld [vmem:[#allocation14 + $0xe0] sm:$0xff]  ;;  %v242_v43 = vld [vmem:[#allocation14 + $0xc8] sm:$0xff]  ;;  %v244_v44 = vld [vmem:[#allocation14 + $0xd8] sm:$0xff] }
  0x71   :  { %310 = vmatpush1.msra.mxu0 %v262_v27  ;;  %381 = vmatpush1.msra.mxu1 %v264_v28  ;;  %v238_v45 = vld [vmem:[#allocation14 + $0xa8] sm:$0xff]  ;;  %v240_v46 = vld [vmem:[#allocation14 + $0xb8] sm:$0xff]  ;;  %v237_v47 = vld [vmem:[#allocation14 + $0xa0] sm:$0xff] }
  0x72   :  { %311 = vmatprep.subr.mxu0 %v258_v29  ;;  %382 = vmatprep.subr.mxu1 %v260_v30  ;;  %v239_v48 = vld [vmem:[#allocation14 + $0xb0] sm:$0xff]  ;;  %v233_v49 = vld [vmem:[#allocation14 + $0x80] sm:$0xff]  ;;  %v232_v51 = vld [vmem:[#allocation14 + $0x78] sm:$0xff] }
  0x73   :  { %312 = vmatpush1.msra.mxu0 %v257_v31  ;;  %383 = vmatpush1.msra.mxu1 %v259_v32  ;;  %v235_v50 = vld [vmem:[#allocation14 + $0x90] sm:$0xff]  ;;  %v234_v52 = vld [vmem:[#allocation14 + $0x88] sm:$0xff]  ;;  %v228_v53 = vld [vmem:[#allocation14 + $0x58] sm:$0xff] }
  0x74   :  { %313 = vmatprep.subr.mxu0 %v253_v33  ;;  %384 = vmatprep.subr.mxu1 %v255_v34  ;;  %v230_v54 = vld [vmem:[#allocation14 + $0x68] sm:$0xff]  ;;  %v227_v55 = vld [vmem:[#allocation14 + $0x50] sm:$0xff]  ;;  %v229_v56 = vld [vmem:[#allocation14 + $0x60] sm:$0xff] }
  0x75   :  { %314 = vmatpush1.msra.mxu0 %v252_v35  ;;  %385 = vmatpush1.msra.mxu1 %v254_v36  ;;  %v223_v57 = vld [vmem:[#allocation14 + $0x30] sm:$0xff]  ;;  %v225_v58 = vld [vmem:[#allocation14 + $0x40] sm:$0xff]  ;;  %v222_v59 = vld [vmem:[#allocation14 + $0x28] sm:$0xff] }
  0x76   :  { %315 = vmatprep.subr.mxu0 %v248_v37  ;;  %386 = vmatprep.subr.mxu1 %v250_v38  ;;  %v224_v60 = vld [vmem:[#allocation14 + $0x38] sm:$0xff]  ;;  %v218_v61 = vld [vmem:[#allocation14 + $0x8] sm:$0xff]  ;;  %v217_v63 = vld [vmem:[#allocation14] sm:$0xff] }
  0x77   :  { %316 = vmatpush1.msra.mxu0 %v247_v39  ;;  %387 = vmatpush1.msra.mxu1 %v249_v40  ;;  %v220_v62 = vld [vmem:[#allocation14 + $0x18] sm:$0xff]  ;;  %v219_v1 = vld [vmem:[#allocation14 + $0x10] sm:$0xff]  ;;  %v1668_v2 = vld [vmem:[#allocation6] sm:$0xff] }
  0x78   :  { %317 = vmatprep.subr.mxu0 %v243_v41  ;;  %388 = vmatprep.subr.mxu1 %v245_v42  ;;  %v212_v3 = vld [vmem:[#allocation12 + $0x260] sm:$0xff]  ;;  %v296_v4 = vld [vmem:[#allocation14 + $0x278] sm:$0xff]  ;;  %v291_v7 = vld [vmem:[#allocation14 + $0x250] sm:$0xff] }
  0x79   :  { %318 = vmatpush1.msra.mxu0 %v242_v43  ;;  %389 = vmatpush1.msra.mxu1 %v244_v44  ;;  %v211_v5 = vld [vmem:[#allocation12 + $0x258] sm:$0xff]  ;;  %v206_v8 = vld [vmem:[#allocation12 + $0x230] sm:$0xff]  ;;  %v286_v10 = vld [vmem:[#allocation14 + $0x228] sm:$0xff] }
  0x7a   :  { %319 = vmatprep.subr.mxu0 %v238_v45  ;;  %390 = vmatprep.subr.mxu1 %v240_v46  ;;  %v207_v6 = vld [vmem:[#allocation12 + $0x238] sm:$0xff]  ;;  %v202_v9 = vld [vmem:[#allocation12 + $0x210] sm:$0xff]  ;;  %v201_v11 = vld [vmem:[#allocation12 + $0x208] sm:$0xff] }
  0x7b   :  { %320 = vmatpush1.msra.mxu0 %v237_v47  ;;  %391 = vmatpush1.msra.mxu1 %v239_v48  ;;  %v197_v12 = vld [vmem:[#allocation12 + $0x1e8] sm:$0xff]  ;;  %v281_v13 = vld [vmem:[#allocation14 + $0x200] sm:$0xff]  ;;  %v276_v16 = vld [vmem:[#allocation14 + $0x1d8] sm:$0xff] }
  0x7c   :  { %321 = vmatprep.subr.mxu0 %v233_v49  ;;  %392 = vmatprep.subr.mxu1 %v235_v50  ;;  %v196_v14 = vld [vmem:[#allocation12 + $0x1e0] sm:$0xff]  ;;  %v191_v17 = vld [vmem:[#allocation12 + $0x1b8] sm:$0xff]  ;;  %v271_v19 = vld [vmem:[#allocation14 + $0x1b0] sm:$0xff] }
  0x7d   :  { %322 = vmatpush1.msra.mxu0 %v232_v51  ;;  %393 = vmatpush1.msra.mxu1 %v234_v52  ;;  %v192_v15 = vld [vmem:[#allocation12 + $0x1c0] sm:$0xff]  ;;  %v187_v18 = vld [vmem:[#allocation12 + $0x198] sm:$0xff]  ;;  %v186_v20 = vld [vmem:[#allocation12 + $0x190] sm:$0xff] }
  0x7e   :  { %323 = vmatprep.subr.mxu0 %v228_v53  ;;  %394 = vmatprep.subr.mxu1 %v230_v54  ;;  %v182_v21 = vld [vmem:[#allocation12 + $0x170] sm:$0xff]  ;;  %v266_v22 = vld [vmem:[#allocation14 + $0x188] sm:$0xff]  ;;  %v261_v25 = vld [vmem:[#allocation14 + $0x160] sm:$0xff] }
  0x7f   :  { %324 = vmatpush1.msra.mxu0 %v227_v55  ;;  %395 = vmatpush1.msra.mxu1 %v229_v56  ;;  %v181_v23 = vld [vmem:[#allocation12 + $0x168] sm:$0xff]  ;;  %v176_v26 = vld [vmem:[#allocation12 + $0x140] sm:$0xff]  ;;  %v256_v28 = vld [vmem:[#allocation14 + $0x138] sm:$0xff] }
  0x80   :  { %325 = vmatprep.subr.mxu0 %v223_v57  ;;  %396 = vmatprep.subr.mxu1 %v225_v58  ;;  %v177_v24 = vld [vmem:[#allocation12 + $0x148] sm:$0xff]  ;;  %v172_v27 = vld [vmem:[#allocation12 + $0x120] sm:$0xff]  ;;  %v171_v29 = vld [vmem:[#allocation12 + $0x118] sm:$0xff] }
  0x81   :  { %326 = vmatpush1.msra.mxu0 %v222_v59  ;;  %397 = vmatpush1.msra.mxu1 %v224_v60  ;;  %v167_v30 = vld [vmem:[#allocation12 + $0xf8] sm:$0xff]  ;;  %v251_v31 = vld [vmem:[#allocation14 + $0x110] sm:$0xff]  ;;  %v246_v34 = vld [vmem:[#allocation14 + $0xe8] sm:$0xff] }
  0x82   :  { %327 = vmatprep.subr.mxu0 %v218_v61  ;;  %398 = vmatprep.subr.mxu1 %v220_v62  ;;  %v166_v32 = vld [vmem:[#allocation12 + $0xf0] sm:$0xff]  ;;  %v161_v35 = vld [vmem:[#allocation12 + $0xc8] sm:$0xff]  ;;  %v241_v37 = vld [vmem:[#allocation14 + $0xc0] sm:$0xff] }
  0x83   :  { %328 = vmatpush1.msra.mxu0 %v217_v63  ;;  %399 = vmatpush1.msra.mxu1 %v219_v1  ;;  %v162_v33 = vld [vmem:[#allocation12 + $0xd0] sm:$0xff]  ;;  %v157_v36 = vld [vmem:[#allocation12 + $0xa8] sm:$0xff]  ;;  %v156_v38 = vld [vmem:[#allocation12 + $0xa0] sm:$0xff] }
  0x84   :  { %362 = vmatmul.mubr.f32.vlgmr.msra.gmra.mxu0 %v1668_v2  ;;  %1211 = vmatprep.subr.mxu0 %v1574_v0  ;;  %v152_v39 = vld [vmem:[#allocation12 + $0x80] sm:$0xff]  ;;  %v236_v40 = vld [vmem:[#allocation14 + $0x98] sm:$0xff]  ;;  %v231_v43 = vld [vmem:[#allocation14 + $0x70] sm:$0xff] }
  0x85   :  { %509 = vmatprep.subr.mxu1 %v212_v3  ;;  %433 = vmatmul.mubr.f32.vlgmr.msra.gmra.mxu1 %v1668_v2  ;;  %v151_v41 = vld [vmem:[#allocation12 + $0x78] sm:$0xff]  ;;  %v146_v44 = vld [vmem:[#allocation12 + $0x50] sm:$0xff]  ;;  %v226_v46 = vld [vmem:[#allocation14 + $0x48] sm:$0xff] }
  0x86   :  { %1212 = vmatpush3.msra.mxu0 %v296_v4  ;;  %510 = vmatpush1.msra.mxu1 %v211_v5  ;;  %v147_v42 = vld [vmem:[#allocation12 + $0x58] sm:$0xff]  ;;  %v142_v45 = vld [vmem:[#allocation12 + $0x30] sm:$0xff]  ;;  %v141_v47 = vld [vmem:[#allocation12 + $0x28] sm:$0xff] }
  0x87   :  { %1213 = vmatprep.subr.mxu0 %v1574_v0  ;;  %511 = vmatprep.subr.mxu1 %v207_v6  ;;  %v137_v48 = vld [vmem:[#allocation12 + $0x8] sm:$0xff]  ;;  %v221_v49 = vld [vmem:[#allocation14 + $0x20] sm:$0xff]  ;;  %v1688_v51 = vld [vmem:[#allocation3] sm:$0xff] }
  0x88   :  { %1214 = vmatpush3.msra.mxu0 %v291_v7  ;;  %512 = vmatpush1.msra.mxu1 %v206_v8  ;;  %v136_v50 = vld [vmem:[#allocation12] sm:$0xff]  ;;  %v214_v52 = vld [vmem:[#allocation12 + $0x270] sm:$0xff]  ;;  %v213_v53 = vld [vmem:[#allocation12 + $0x268] sm:$0xff] }
  0x89   :  { %1215 = vmatprep.subr.mxu0 %v1574_v0  ;;  %513 = vmatprep.subr.mxu1 %v202_v9  ;;  %v215_v54 = vld [vmem:[#allocation12 + $0x278] sm:$0xff]  ;;  %v209_v55 = vld [vmem:[#allocation12 + $0x248] sm:$0xff]  ;;  %v208_v56 = vld [vmem:[#allocation12 + $0x240] sm:$0xff] }
  0x8a   :  { %1216 = vmatpush3.msra.mxu0 %v286_v10  ;;  %514 = vmatpush1.msra.mxu1 %v201_v11  ;;  %v210_v57 = vld [vmem:[#allocation12 + $0x250] sm:$0xff]  ;;  %v204_v58 = vld [vmem:[#allocation12 + $0x220] sm:$0xff]  ;;  %v203_v59 = vld [vmem:[#allocation12 + $0x218] sm:$0xff] }
  0x8b   :  { %1217 = vmatprep.subr.mxu0 %v1574_v0  ;;  %515 = vmatprep.subr.mxu1 %v197_v12  ;;  %v205_v60 = vld [vmem:[#allocation12 + $0x228] sm:$0xff]  ;;  %v199_v61 = vld [vmem:[#allocation12 + $0x1f8] sm:$0xff]  ;;  %v198_v62 = vld [vmem:[#allocation12 + $0x1f0] sm:$0xff] }
  0x8c   :  { %1218 = vmatpush3.msra.mxu0 %v281_v13  ;;  %516 = vmatpush1.msra.mxu1 %v196_v14  ;;  %v200_v63 = vld [vmem:[#allocation12 + $0x200] sm:$0xff]  ;;  %v194_v1 = vld [vmem:[#allocation12 + $0x1d0] sm:$0xff]  ;;  %v195_v3 = vld [vmem:[#allocation12 + $0x1d8] sm:$0xff] }
  0x8d   :  { %1219 = vmatprep.subr.mxu0 %v1574_v0  ;;  %517 = vmatprep.subr.mxu1 %v192_v15  ;;  %v189_v4 = vld [vmem:[#allocation12 + $0x1a8] sm:$0xff]  ;;  %v188_v5 = vld [vmem:[#allocation12 + $0x1a0] sm:$0xff]  ;;  %v190_v6 = vld [vmem:[#allocation12 + $0x1b0] sm:$0xff] }
  0x8e   :  { %1220 = vmatpush3.msra.mxu0 %v276_v16  ;;  %518 = vmatpush1.msra.mxu1 %v191_v17  ;;  %v184_v7 = vld [vmem:[#allocation12 + $0x180] sm:$0xff]  ;;  %v183_v8 = vld [vmem:[#allocation12 + $0x178] sm:$0xff]  ;;  %v185_v9 = vld [vmem:[#allocation12 + $0x188] sm:$0xff] }
  0x8f   :  { %1221 = vmatprep.subr.mxu0 %v1574_v0  ;;  %519 = vmatprep.subr.mxu1 %v187_v18  ;;  %v179_v10 = vld [vmem:[#allocation12 + $0x158] sm:$0xff]  ;;  %v178_v11 = vld [vmem:[#allocation12 + $0x150] sm:$0xff]  ;;  %v180_v12 = vld [vmem:[#allocation12 + $0x160] sm:$0xff] }
  0x90   :  { %1222 = vmatpush3.msra.mxu0 %v271_v19  ;;  %520 = vmatpush1.msra.mxu1 %v186_v20  ;;  %v174_v13 = vld [vmem:[#allocation12 + $0x130] sm:$0xff]  ;;  %v173_v14 = vld [vmem:[#allocation12 + $0x128] sm:$0xff]  ;;  %v175_v15 = vld [vmem:[#allocation12 + $0x138] sm:$0xff] }
  0x91   :  { %1223 = vmatprep.subr.mxu0 %v1574_v0  ;;  %521 = vmatprep.subr.mxu1 %v182_v21  ;;  %v169_v16 = vld [vmem:[#allocation12 + $0x108] sm:$0xff]  ;;  %v168_v17 = vld [vmem:[#allocation12 + $0x100] sm:$0xff]  ;;  %v170_v18 = vld [vmem:[#allocation12 + $0x110] sm:$0xff] }
  0x92   :  { %1224 = vmatpush3.msra.mxu0 %v266_v22  ;;  %522 = vmatpush1.msra.mxu1 %v181_v23  ;;  %v164_v19 = vld [vmem:[#allocation12 + $0xe0] sm:$0xff]  ;;  %v163_v20 = vld [vmem:[#allocation12 + $0xd8] sm:$0xff]  ;;  %v165_v21 = vld [vmem:[#allocation12 + $0xe8] sm:$0xff] }
  0x93   :  { %1225 = vmatprep.subr.mxu0 %v1574_v0  ;;  %523 = vmatprep.subr.mxu1 %v177_v24  ;;  %v159_v22 = vld [vmem:[#allocation12 + $0xb8] sm:$0xff]  ;;  %v158_v23 = vld [vmem:[#allocation12 + $0xb0] sm:$0xff]  ;;  %v160_v24 = vld [vmem:[#allocation12 + $0xc0] sm:$0xff] }
  0x94   :  { %1226 = vmatpush3.msra.mxu0 %v261_v25  ;;  %524 = vmatpush1.msra.mxu1 %v176_v26  ;;  %v154_v25 = vld [vmem:[#allocation12 + $0x90] sm:$0xff]  ;;  %v153_v26 = vld [vmem:[#allocation12 + $0x88] sm:$0xff] }
  0x95   :  { %1227 = vmatprep.subr.mxu0 %v1574_v0  ;;  %525 = vmatprep.subr.mxu1 %v172_v27  ;;  %v155_v27 = vld [vmem:[#allocation12 + $0x98] sm:$0xff] }
  0x96   :  { %1228 = vmatpush3.msra.mxu0 %v256_v28  ;;  %526 = vmatpush1.msra.mxu1 %v171_v29  ;;  %v149_v28 = vld [vmem:[#allocation12 + $0x68] sm:$0xff]  ;;  %v148_v29 = vld [vmem:[#allocation12 + $0x60] sm:$0xff] }
  0x97   :  { %1229 = vmatprep.subr.mxu0 %v1574_v0  ;;  %527 = vmatprep.subr.mxu1 %v167_v30  ;;  %v150_v30 = vld [vmem:[#allocation12 + $0x70] sm:$0xff] }
  0x98   :  { %1230 = vmatpush3.msra.mxu0 %v251_v31  ;;  %528 = vmatpush1.msra.mxu1 %v166_v32  ;;  %v144_v31 = vld [vmem:[#allocation12 + $0x40] sm:$0xff]  ;;  %v143_v32 = vld [vmem:[#allocation12 + $0x38] sm:$0xff] }
  0x99   :  { %1231 = vmatprep.subr.mxu0 %v1574_v0  ;;  %529 = vmatprep.subr.mxu1 %v162_v33  ;;  %v145_v33 = vld [vmem:[#allocation12 + $0x48] sm:$0xff] }
  0x9a   :  { %1232 = vmatpush3.msra.mxu0 %v246_v34  ;;  %530 = vmatpush1.msra.mxu1 %v161_v35  ;;  %v139_v34 = vld [vmem:[#allocation12 + $0x18] sm:$0xff]  ;;  %v138_v35 = vld [vmem:[#allocation12 + $0x10] sm:$0xff] }
  0x9b   :  { %1233 = vmatprep.subr.mxu0 %v1574_v0  ;;  %531 = vmatprep.subr.mxu1 %v157_v36  ;;  %v140_v36 = vld [vmem:[#allocation12 + $0x20] sm:$0xff] }
  0x9c   :  { %1234 = vmatpush3.msra.mxu0 %v241_v37  ;;  %532 = vmatpush1.msra.mxu1 %v156_v38  ;;  %v798_v37 = vld [vmem:[#allocation15 + $0x260] sm:$0xff]  ;;  %v800_v38 = vld [vmem:[#allocation15 + $0x270] sm:$0xff] }
  0x9d   :  { %1235 = vmatprep.subr.mxu0 %v1574_v0  ;;  %533 = vmatprep.subr.mxu1 %v152_v39  ;;  %v797_v39 = vld [vmem:[#allocation15 + $0x258] sm:$0xff] }
  0x9e   :  { %1236 = vmatpush3.msra.mxu0 %v236_v40  ;;  %534 = vmatpush1.msra.mxu1 %v151_v41  ;;  %v799_v40 = vld [vmem:[#allocation15 + $0x268] sm:$0xff]  ;;  %v793_v41 = vld [vmem:[#allocation15 + $0x238] sm:$0xff] }
  0x9f   :  { %1237 = vmatprep.subr.mxu0 %v1574_v0  ;;  %535 = vmatprep.subr.mxu1 %v147_v42  ;;  %v795_v42 = vld [vmem:[#allocation15 + $0x248] sm:$0xff] }
  0xa0   :  { %1238 = vmatpush3.msra.mxu0 %v231_v43  ;;  %536 = vmatpush1.msra.mxu1 %v146_v44  ;;  %v792_v43 = vld [vmem:[#allocation15 + $0x230] sm:$0xff]  ;;  %v794_v44 = vld [vmem:[#allocation15 + $0x240] sm:$0xff] }
  0xa1   :  { %1239 = vmatprep.subr.mxu0 %v1574_v0  ;;  %537 = vmatprep.subr.mxu1 %v142_v45  ;;  %v788_v45 = vld [vmem:[#allocation15 + $0x210] sm:$0xff] }
  0xa2   :  { %1240 = vmatpush3.msra.mxu0 %v226_v46  ;;  %538 = vmatpush1.msra.mxu1 %v141_v47  ;;  %v790_v46 = vld [vmem:[#allocation15 + $0x220] sm:$0xff]  ;;  %v787_v47 = vld [vmem:[#allocation15 + $0x208] sm:$0xff] }
  0xa3   :  { %1241 = vmatprep.subr.mxu0 %v1574_v0  ;;  %539 = vmatprep.subr.mxu1 %v137_v48  ;;  %v789_v48 = vld [vmem:[#allocation15 + $0x218] sm:$0xff] }
  0xa4   :  { %1242 = vmatpush3.msra.mxu0 %v221_v49  ;;  %1243 = vmatprep.mubr.msk.f32.mxu0 %vm1575_vm0, %v1574_v0  ;;  %v783_v49 = vld [vmem:[#allocation15 + $0x1e8] sm:$0xff] }
  0xa5   :  { %540 = vmatpush1.msra.mxu1 %v136_v50  ;;  %573 = vmatprep.mubr.f32.mxu1 %v1574_v0  ;;  %v785_v50 = vld [vmem:[#allocation15 + $0x1f8] sm:$0xff] }
  0xa6   :  { %1244 = vmatmul.mubr.f32.vlgmr.msra.gmra.mxu0 %v1668_v2  ;;  %574 = vmatmul.mubr.f32.vlgmr.msra.gmra.mxu1 %v1688_v51  ;;  %v193_v2 = vld [vmem:[#allocation12 + $0x1c8] sm:$0xff] }
  0xa7   :  { %580 = vmatprep.subr.mxu0 %v214_v52  ;;  %1246 = vmatprep.subr.mxu1 %v1574_v0  ;;  %v784_v52 = vld [vmem:[#allocation15 + $0x1f0] sm:$0xff] }
  0xa8   :  { %581 = vmatpush1.msra.mxu0 %v213_v53  ;;  %1247 = vmatpush3.msra.mxu1 %v215_v54  ;;  %v778_v53 = vld [vmem:[#allocation15 + $0x1c0] sm:$0xff]  ;;  %v780_v54 = vld [vmem:[#allocation15 + $0x1d0] sm:$0xff] }
  0xa9   :  { %582 = vmatprep.subr.mxu0 %v209_v55  ;;  %1248 = vmatprep.subr.mxu1 %v1574_v0  ;;  %v777_v55 = vld [vmem:[#allocation15 + $0x1b8] sm:$0xff] }
  0xaa   :  { %583 = vmatpush1.msra.mxu0 %v208_v56  ;;  %1249 = vmatpush3.msra.mxu1 %v210_v57  ;;  %v779_v56 = vld [vmem:[#allocation15 + $0x1c8] sm:$0xff]  ;;  %v773_v57 = vld [vmem:[#allocation15 + $0x198] sm:$0xff] }
  0xab   :  { %584 = vmatprep.subr.mxu0 %v204_v58  ;;  %1250 = vmatprep.subr.mxu1 %v1574_v0  ;;  %v775_v58 = vld [vmem:[#allocation15 + $0x1a8] sm:$0xff] }
  0xac   :  { %585 = vmatpush1.msra.mxu0 %v203_v59  ;;  %1251 = vmatpush3.msra.mxu1 %v205_v60  ;;  %v772_v59 = vld [vmem:[#allocation15 + $0x190] sm:$0xff]  ;;  %v774_v60 = vld [vmem:[#allocation15 + $0x1a0] sm:$0xff] }
  0xad   :  { %586 = vmatprep.subr.mxu0 %v199_v61  ;;  %1252 = vmatprep.subr.mxu1 %v1574_v0  ;;  %v768_v61 = vld [vmem:[#allocation15 + $0x170] sm:$0xff] }
  0xae   :  { %587 = vmatpush1.msra.mxu0 %v198_v62  ;;  %1253 = vmatpush3.msra.mxu1 %v200_v63  ;;  %v770_v62 = vld [vmem:[#allocation15 + $0x180] sm:$0xff]  ;;  %v767_v63 = vld [vmem:[#allocation15 + $0x168] sm:$0xff] }
  0xaf   :  { %588 = vmatprep.subr.mxu0 %v194_v1  ;;  %1254 = vmatprep.subr.mxu1 %v1574_v0  ;;  %v769_v1 = vld [vmem:[#allocation15 + $0x178] sm:$0xff] }
  0xb0   :  { %589 = vmatpush1.msra.mxu0 %v193_v2  ;;  %1255 = vmatpush3.msra.mxu1 %v195_v3  ;;  %v763_v2 = vld [vmem:[#allocation15 + $0x148] sm:$0xff]  ;;  %v765_v3 = vld [vmem:[#allocation15 + $0x158] sm:$0xff] }
  0xb1   :  { %590 = vmatprep.subr.mxu0 %v189_v4  ;;  %1256 = vmatprep.subr.mxu1 %v1574_v0  ;;  %v762_v4 = vld [vmem:[#allocation15 + $0x140] sm:$0xff] }
  0xb2   :  { %591 = vmatpush1.msra.mxu0 %v188_v5  ;;  %1257 = vmatpush3.msra.mxu1 %v190_v6  ;;  %v764_v5 = vld [vmem:[#allocation15 + $0x150] sm:$0xff]  ;;  %v758_v6 = vld [vmem:[#allocation15 + $0x120] sm:$0xff] }
  0xb3   :  { %592 = vmatprep.subr.mxu0 %v184_v7  ;;  %1258 = vmatprep.subr.mxu1 %v1574_v0  ;;  %v760_v7 = vld [vmem:[#allocation15 + $0x130] sm:$0xff] }
  0xb4   :  { %593 = vmatpush1.msra.mxu0 %v183_v8  ;;  %1259 = vmatpush3.msra.mxu1 %v185_v9  ;;  %v757_v8 = vld [vmem:[#allocation15 + $0x118] sm:$0xff]  ;;  %v759_v9 = vld [vmem:[#allocation15 + $0x128] sm:$0xff] }
  0xb5   :  { %594 = vmatprep.subr.mxu0 %v179_v10  ;;  %1260 = vmatprep.subr.mxu1 %v1574_v0  ;;  %v753_v10 = vld [vmem:[#allocation15 + $0xf8] sm:$0xff] }
  0xb6   :  { %595 = vmatpush1.msra.mxu0 %v178_v11  ;;  %1261 = vmatpush3.msra.mxu1 %v180_v12  ;;  %v755_v11 = vld [vmem:[#allocation15 + $0x108] sm:$0xff]  ;;  %v752_v12 = vld [vmem:[#allocation15 + $0xf0] sm:$0xff] }
  0xb7   :  { %596 = vmatprep.subr.mxu0 %v174_v13  ;;  %1262 = vmatprep.subr.mxu1 %v1574_v0  ;;  %v754_v13 = vld [vmem:[#allocation15 + $0x100] sm:$0xff] }
  0xb8   :  { %597 = vmatpush1.msra.mxu0 %v173_v14  ;;  %1263 = vmatpush3.msra.mxu1 %v175_v15  ;;  %v748_v14 = vld [vmem:[#allocation15 + $0xd0] sm:$0xff]  ;;  %v750_v15 = vld [vmem:[#allocation15 + $0xe0] sm:$0xff] }
  0xb9   :  { %598 = vmatprep.subr.mxu0 %v169_v16  ;;  %1264 = vmatprep.subr.mxu1 %v1574_v0  ;;  %v747_v16 = vld [vmem:[#allocation15 + $0xc8] sm:$0xff] }
  0xba   :  { %599 = vmatpush1.msra.mxu0 %v168_v17  ;;  %1265 = vmatpush3.msra.mxu1 %v170_v18  ;;  %v749_v17 = vld [vmem:[#allocation15 + $0xd8] sm:$0xff]  ;;  %v743_v18 = vld [vmem:[#allocation15 + $0xa8] sm:$0xff] }
  0xbb   :  { %600 = vmatprep.subr.mxu0 %v164_v19  ;;  %1266 = vmatprep.subr.mxu1 %v1574_v0  ;;  %v745_v19 = vld [vmem:[#allocation15 + $0xb8] sm:$0xff] }
  0xbc   :  { %601 = vmatpush1.msra.mxu0 %v163_v20  ;;  %1267 = vmatpush3.msra.mxu1 %v165_v21  ;;  %v742_v20 = vld [vmem:[#allocation15 + $0xa0] sm:$0xff]  ;;  %v744_v21 = vld [vmem:[#allocation15 + $0xb0] sm:$0xff] }
  0xbd   :  { %602 = vmatprep.subr.mxu0 %v159_v22  ;;  %1268 = vmatprep.subr.mxu1 %v1574_v0  ;;  %v738_v22 = vld [vmem:[#allocation15 + $0x80] sm:$0xff] }
  0xbe   :  { %603 = vmatpush1.msra.mxu0 %v158_v23  ;;  %1269 = vmatpush3.msra.mxu1 %v160_v24  ;;  %v740_v23 = vld [vmem:[#allocation15 + $0x90] sm:$0xff]  ;;  %v737_v24 = vld [vmem:[#allocation15 + $0x78] sm:$0xff] }
  0xbf   :  { %604 = vmatprep.subr.mxu0 %v154_v25  ;;  %1270 = vmatprep.subr.mxu1 %v1574_v0  ;;  %v739_v25 = vld [vmem:[#allocation15 + $0x88] sm:$0xff] }
  0xc0   :  { %605 = vmatpush1.msra.mxu0 %v153_v26  ;;  %1271 = vmatpush3.msra.mxu1 %v155_v27  ;;  %v733_v26 = vld [vmem:[#allocation15 + $0x58] sm:$0xff]  ;;  %v735_v27 = vld [vmem:[#allocation15 + $0x68] sm:$0xff] }
  0xc1   :  { %606 = vmatprep.subr.mxu0 %v149_v28  ;;  %1272 = vmatprep.subr.mxu1 %v1574_v0  ;;  %v732_v28 = vld [vmem:[#allocation15 + $0x50] sm:$0xff] }
  0xc2   :  { %607 = vmatpush1.msra.mxu0 %v148_v29  ;;  %1273 = vmatpush3.msra.mxu1 %v150_v30  ;;  %v734_v29 = vld [vmem:[#allocation15 + $0x60] sm:$0xff]  ;;  %v728_v30 = vld [vmem:[#allocation15 + $0x30] sm:$0xff] }
  0xc3   :  { %608 = vmatprep.subr.mxu0 %v144_v31  ;;  %1274 = vmatprep.subr.mxu1 %v1574_v0  ;;  %v730_v31 = vld [vmem:[#allocation15 + $0x40] sm:$0xff] }
  0xc4   :  { %609 = vmatpush1.msra.mxu0 %v143_v32  ;;  %1275 = vmatpush3.msra.mxu1 %v145_v33  ;;  %v727_v32 = vld [vmem:[#allocation15 + $0x28] sm:$0xff]  ;;  %v729_v33 = vld [vmem:[#allocation15 + $0x38] sm:$0xff] }
  0xc5   :  { %610 = vmatprep.subr.mxu0 %v139_v34  ;;  %1276 = vmatprep.subr.mxu1 %v1574_v0  ;;  %v723_v34 = vld [vmem:[#allocation15 + $0x8] sm:$0xff] }
  0xc6   :  { %611 = vmatpush1.msra.mxu0 %v138_v35  ;;  %644 = vmatprep.mubr.f32.mxu0 %v1574_v0  ;;  %v725_v35 = vld [vmem:[#allocation15 + $0x18] sm:$0xff] }
  0xc7   :  { %1277 = vmatpush3.msra.mxu1 %v140_v36  ;;  %1278 = vmatprep.mubr.msk.f32.mxu1 %vm1575_vm0, %v1574_v0  ;;  %v722_v36 = vld [vmem:[#allocation15] sm:$0xff] }
  0xc8   :  { %645 = vmatmul.mubr.f32.vlgmr.msra.gmra.mxu0 %v1688_v51  ;;  %1279 = vmatmul.mubr.f32.vlgmr.msra.gmra.mxu1 %v1688_v51  ;;  %v782_v51 = vld [vmem:[#allocation15 + $0x1e0] sm:$0xff] }
  0xc9   :  { %802 = vmatprep.subr.mxu0 %v798_v37  ;;  %873 = vmatprep.subr.mxu1 %v800_v38  ;;  %v724_v37 = vld [vmem:[#allocation15 + $0x10] sm:$0xff]  ;;  %v721_v38 = vld [vmem:[#allocation8] sm:$0xff] }
  0xca   :  { %803 = vmatpush1.msra.mxu0 %v797_v39  ;;  %874 = vmatpush1.msra.mxu1 %v799_v40  ;;  %v801_v39 = vld [vmem:[#allocation15 + $0x278] sm:$0xff]  ;;  %v796_v40 = vld [vmem:[#allocation15 + $0x250] sm:$0xff] }
  0xcb   :  { %804 = vmatprep.subr.mxu0 %v793_v41  ;;  %875 = vmatprep.subr.mxu1 %v795_v42  ;;  %v791_v41 = vld [vmem:[#allocation15 + $0x228] sm:$0xff]  ;;  %v786_v42 = vld [vmem:[#allocation15 + $0x200] sm:$0xff] }
  0xcc   :  { %805 = vmatpush1.msra.mxu0 %v792_v43  ;;  %876 = vmatpush1.msra.mxu1 %v794_v44  ;;  %v781_v43 = vld [vmem:[#allocation15 + $0x1d8] sm:$0xff]  ;;  %v776_v44 = vld [vmem:[#allocation15 + $0x1b0] sm:$0xff] }
  0xcd   :  { %806 = vmatprep.subr.mxu0 %v788_v45  ;;  %877 = vmatprep.subr.mxu1 %v790_v46  ;;  %v771_v45 = vld [vmem:[#allocation15 + $0x188] sm:$0xff]  ;;  %v766_v46 = vld [vmem:[#allocation15 + $0x160] sm:$0xff] }
  0xce   :  { %807 = vmatpush1.msra.mxu0 %v787_v47  ;;  %878 = vmatpush1.msra.mxu1 %v789_v48  ;;  %v761_v47 = vld [vmem:[#allocation15 + $0x138] sm:$0xff]  ;;  %v756_v48 = vld [vmem:[#allocation15 + $0x110] sm:$0xff] }
  0xcf   :  { %808 = vmatprep.subr.mxu0 %v783_v49  ;;  %879 = vmatprep.subr.mxu1 %v785_v50  ;;  %v751_v49 = vld [vmem:[#allocation15 + $0xe8] sm:$0xff]  ;;  %v746_v50 = vld [vmem:[#allocation15 + $0xc0] sm:$0xff] }
  0xd0   :  { %809 = vmatpush1.msra.mxu0 %v782_v51  ;;  %880 = vmatpush1.msra.mxu1 %v784_v52  ;;  %v741_v51 = vld [vmem:[#allocation15 + $0x98] sm:$0xff]  ;;  %v736_v52 = vld [vmem:[#allocation15 + $0x70] sm:$0xff] }
  0xd1   :  { %810 = vmatprep.subr.mxu0 %v778_v53  ;;  %881 = vmatprep.subr.mxu1 %v780_v54  ;;  %v731_v53 = vld [vmem:[#allocation15 + $0x48] sm:$0xff]  ;;  %v726_v54 = vld [vmem:[#allocation15 + $0x20] sm:$0xff] }
  0xd2   :  { %811 = vmatpush1.msra.mxu0 %v777_v55  ;;  %882 = vmatpush1.msra.mxu1 %v779_v56 }
  0xd3   :  { %812 = vmatprep.subr.mxu0 %v773_v57  ;;  %883 = vmatprep.subr.mxu1 %v775_v58 }
  0xd4   :  { %813 = vmatpush1.msra.mxu0 %v772_v59  ;;  %884 = vmatpush1.msra.mxu1 %v774_v60 }
  0xd5   :  { %814 = vmatprep.subr.mxu0 %v768_v61  ;;  %885 = vmatprep.subr.mxu1 %v770_v62 }
  0xd6   :  { %815 = vmatpush1.msra.mxu0 %v767_v63  ;;  %886 = vmatpush1.msra.mxu1 %v769_v1 }
  0xd7   :  { %816 = vmatprep.subr.mxu0 %v763_v2  ;;  %887 = vmatprep.subr.mxu1 %v765_v3  ;;  %v1057_v3 = vlaneseq }
  0xd8   :  { %817 = vmatpush1.msra.mxu0 %v762_v4  ;;  %888 = vmatpush1.msra.mxu1 %v764_v5 }
  0xd9   :  { %818 = vmatprep.subr.mxu0 %v758_v6  ;;  %889 = vmatprep.subr.mxu1 %v760_v7  ;;  %v1058_v4 = vshrl.u32 %v1057_v3, 7 }
  0xda   :  { %819 = vmatpush1.msra.mxu0 %v757_v8  ;;  %890 = vmatpush1.msra.mxu1 %v759_v9 }
  0xdb   :  { %820 = vmatprep.subr.mxu0 %v753_v10  ;;  %891 = vmatprep.subr.mxu1 %v755_v11  ;;  %v1067_v6 = vsub.s32 2, %v1058_v4  ;;  %v1063_v7 = vsub.s32 1, %v1058_v4  ;;  %v1071_v8 = vsub.s32 3, %v1058_v4 }
  0xdc   :  { %821 = vmatpush1.msra.mxu0 %v752_v12  ;;  %892 = vmatpush1.msra.mxu1 %v754_v13 }
  0xdd   :  { %822 = vmatprep.subr.mxu0 %v748_v14  ;;  %893 = vmatprep.subr.mxu1 %v750_v15 }
  0xde   :  { %823 = vmatpush1.msra.mxu0 %v747_v16  ;;  %894 = vmatpush1.msra.mxu1 %v749_v17 }
  0xdf   :  { %824 = vmatprep.subr.mxu0 %v743_v18  ;;  %895 = vmatprep.subr.mxu1 %v745_v19 }
  0xe0   :  { %825 = vmatpush1.msra.mxu0 %v742_v20  ;;  %896 = vmatpush1.msra.mxu1 %v744_v21 }
  0xe1   :  { %826 = vmatprep.subr.mxu0 %v738_v22  ;;  %897 = vmatprep.subr.mxu1 %v740_v23 }
  0xe2   :  { %827 = vmatpush1.msra.mxu0 %v737_v24  ;;  %898 = vmatpush1.msra.mxu1 %v739_v25 }
  0xe3   :  { %828 = vmatprep.subr.mxu0 %v733_v26  ;;  %899 = vmatprep.subr.mxu1 %v735_v27 }
  0xe4   :  { %829 = vmatpush1.msra.mxu0 %v732_v28  ;;  %900 = vmatpush1.msra.mxu1 %v734_v29  ;;  %v1059_v29 = vsub.s32 0, %v1058_v4 }
  0xe5   :  { %830 = vmatprep.subr.mxu0 %v728_v30  ;;  %901 = vmatprep.subr.mxu1 %v730_v31 }
  0xe6   :  { %831 = vmatpush1.msra.mxu0 %v727_v32  ;;  %902 = vmatpush1.msra.mxu1 %v729_v33 }
  0xe7   :  { %832 = vmatprep.subr.mxu0 %v723_v34  ;;  %903 = vmatprep.subr.mxu1 %v725_v35 }
  0xe8   :  { %833 = vmatpush1.msra.mxu0 %v722_v36  ;;  %866 = vmatprep.mubr.f32.mxu0 %v1574_v0 }
  0xe9   :  { %904 = vmatpush1.msra.mxu1 %v724_v37  ;;  %937 = vmatprep.mubr.f32.mxu1 %v1574_v0 }
  0xea   :  { %867 = vmatmul.mubr.f32.vlgmr.msra.gmra.mxu0 %v721_v38  ;;  %938 = vmatmul.mubr.f32.vlgmr.msra.gmra.mxu1 %v721_v38 }
  0xeb   :  { %1281 = vmatprep.subr.mxu0 %v1574_v0  ;;  %1313 = vmatprep.mubr.msk.f32.mxu0 %vm1575_vm0, %v1574_v0 }
  0xec   :  { %1282 = vmatpush3.msra.mxu0 %v801_v39 }
  0xed   :  { %1283 = vmatprep.subr.mxu0 %v1574_v0 }
  0xee   :  { %1284 = vmatpush3.msra.mxu0 %v796_v40  ;;  %v1075_v40 = vsub.s32 4, %v1058_v4 }
  0xef   :  { %1285 = vmatprep.subr.mxu0 %v1574_v0 }
  0xf0   :  { %1286 = vmatpush3.msra.mxu0 %v791_v41 }
  0xf1   :  { %1287 = vmatprep.subr.mxu0 %v1574_v0 }
  0xf2   :  { %1288 = vmatpush3.msra.mxu0 %v786_v42 }
  0xf3   :  { %1289 = vmatprep.subr.mxu0 %v1574_v0 }
  0xf4   :  { %1290 = vmatpush3.msra.mxu0 %v781_v43 }
  0xf5   :  { %1291 = vmatprep.subr.mxu0 %v1574_v0 }
  0xf6   :  { %1292 = vmatpush3.msra.mxu0 %v776_v44 }
  0xf7   :  { %1293 = vmatprep.subr.mxu0 %v1574_v0 }
  0xf8   :  { %1294 = vmatpush3.msra.mxu0 %v771_v45 }
  0xf9   :  { %1295 = vmatprep.subr.mxu0 %v1574_v0 }
  0xfa   :  { %1296 = vmatpush3.msra.mxu0 %v766_v46  ;;  %v1111_v46 = vld [vmem:[#allocation9] sm:$0xff] }
  0xfb   :  { %1297 = vmatprep.subr.mxu0 %v1574_v0 }
  0xfc   :  { %1298 = vmatpush3.msra.mxu0 %v761_v47 }
  0xfd   :  { %1299 = vmatprep.subr.mxu0 %v1574_v0 }
  0xfe   :  { %1300 = vmatpush3.msra.mxu0 %v756_v48 }
  0xff   :  { %1301 = vmatprep.subr.mxu0 %v1574_v0 }
 0x100   :  { %1302 = vmatpush3.msra.mxu0 %v751_v49 }
 0x101   :  { %1303 = vmatprep.subr.mxu0 %v1574_v0 }
 0x102   :  { %1304 = vmatpush3.msra.mxu0 %v746_v50  ;;  %v1112_v50 = vld [vmem:[#allocation11] sm:$0xff] }
 0x103   :  { %1305 = vmatprep.subr.mxu0 %v1574_v0 }
 0x104   :  { %1306 = vmatpush3.msra.mxu0 %v741_v51 }
 0x105   :  { %1307 = vmatprep.subr.mxu0 %v1574_v0 }
 0x106   :  { %1308 = vmatpush3.msra.mxu0 %v736_v52 }
 0x107   :  { %1309 = vmatprep.subr.mxu0 %v1574_v0 }
 0x108   :  { %1310 = vmatpush3.msra.mxu0 %v731_v53 }
 0x109   :  { %1311 = vmatprep.subr.mxu0 %v1574_v0  ;;  %v1055_v0 = vld [vmem:[%s1753_s8] sm:$0x1f]  ;;  %s1576_s8 = smov [#allocation18]  }
 0x10a   :  { %1312 = vmatpush3.msra.mxu0 %v726_v54  ;;  %v1068_v11 = vrot.slane %v1055_v0, %v1067_v6  ;;  %v1064_v14 = vrot.slane %v1055_v0, %v1063_v7  ;;  %v1072_v18 = vrot.slane %v1055_v0, %v1071_v8  ;;  %v1060_v32 = vrot.slane %v1055_v0, %v1059_v29  ;;  %s1139_s1 = sshll.u32 %s1576_s8, 4  ;;  %s1140_s1 = int_to_ptr.vmem [resolvable:$true] %s1139_s1 }
 0x10b   :  { %1314 = vmatmul.mubr.f32.vlgmr.msra.gmra.mxu0 %v721_v38  ;;  %v1076_v41 = vrot.slane %v1055_v0, %v1075_v40  ;;  %s1510_s26 = scalar_lea.vmem %s1140_s1, 128  ;;  %p1515_p13 = scmp.lt.s32.totalorder %s1140_s1, %s1140_s1 }
 0x10c   :  { %p1511_p12 = scmp.ne.s32.totalorder %s1140_s1, %s1510_s26  ;;  %p1516_p0 = scmp.lt.s32.totalorder %s1510_s26, %s1510_s26 }
 0x10e   :  { %p1517_p1 = por %p1516_p0, %p1515_p13 }
 0x110   :  { %p1518_p2 = pnand %p1517_p1, %p1511_p12 }
 0x144   :  { %v363_v55 = vpop.f32.mrf.mxu0 }
 0x145   :  { %v434_v59 = vpop.f32.mrf.mxu1 }
 0x146   :  { %v365_v56 = vpop.f32.mrf.mxu0 }
 0x147   :  { %v436_v60 = vpop.f32.mrf.mxu1 }
 0x166   :  { %v505_v57 = vpop.f32.mrf.mxu0  ;;  %v575_v61 = vpop.f32.mrf.mxu1 }
 0x167   :  { %v576_v30 = vadd.f32 %v575_v61, %v363_v55 }
 0x168   :  { %v1245_v58 = vpop.f32.mrf.mxu0  ;;  %v577_v62 = vpop.f32.mrf.mxu1 }
 0x169   :  { %v578_v15 = vadd.f32 %v577_v62, %v365_v56 }
 0x188   :  { %v717_v63 = vpop.f32.mrf.mxu1  ;;  %v646_v5 = vpop.f32.mrf.mxu0 }
 0x189   :  { %v718_v1 = vadd.f32 %v717_v63, %v505_v57  ;;  %v647_v10 = vadd.f32 %v646_v5, %v434_v59 }
 0x18a   :  { %v1280_v2 = vpop.f32.mrf.mxu1  ;;  %v648_v9 = vpop.f32.mrf.mxu0 }
 0x18b   :  { %v649_v16 = vadd.f32 %v648_v9, %v436_v60 }
 0x1aa   :  { %v868_v12 = vpop.f32.mrf.mxu0  ;;  %v939_v13 = vpop.f32.mrf.mxu1 }
 0x1ab   :  { %v1016_v17 = vadd.f32 %v939_v13, %v647_v10  ;;  %v1014_v31 = vadd.f32 %v868_v12, %v576_v30 }
 0x1ac   :  { %v870_v19 = vpop.f32.mrf.mxu0  ;;  %v941_v20 = vpop.f32.mrf.mxu1 }
 0x1ad   :  { %v1084_v21 = vadd.f32 %v1068_v11, %v1016_v17  ;;  %v1015_v22 = vadd.f32 %v870_v19, %v578_v15  ;;  %v1017_v23 = vadd.f32 %v941_v20, %v649_v16  ;;  %v1082_v34 = vadd.f32 %v1060_v32, %v1014_v31 }
 0x1af   :  { %v1157_v24 = vmul.f32 -1.442695, %v1084_v21  ;;  %v1083_v25 = vadd.f32 %v1064_v14, %v1015_v22  ;;  %v1085_v26 = vadd.f32 %v1072_v18, %v1017_v23 }
 0x1b1   :  { %1330 = vpow2.f32 %v1157_v24  ;;  %v1156_v27 = vmul.f32 -1.442695, %v1083_v25  ;;  %v1158_v28 = vmul.f32 -1.442695, %v1085_v26 }
 0x1b3   :  { %1332 = vpow2.f32 %v1156_v27 }
 0x1b4   :  { %1334 = vpow2.f32 %v1158_v28 }
 0x1be   :  { %v1331_v33 = vpop.eup %1330 }
 0x1bf   :  { %v1100_v35 = vadd.f32 1.0, %v1331_v33 }
 0x1c0   :  { %v1333_v36 = vpop.eup %1332 }
 0x1c1   :  { %v1335_v37 = vpop.eup %1334  ;;  %1336 = vrcp.f32 %v1100_v35  ;;  %v1099_v38 = vadd.f32 1.0, %v1333_v36 }
 0x1c2   :  { %1338 = vtanh.f32 %v1082_v34  ;;  %v1101_v39 = vadd.f32 1.0, %v1335_v37 }
 0x1c3   :  { %1340 = vrcp.f32 %v1099_v38 }
 0x1c4   :  { %1342 = vrcp.f32 %v1101_v39 }
 0x1cb   :  { %v1010_v42 = vpop.f32.mrf.mxu0 }
 0x1cc   :  { %v1018_v43 = vadd.f32 %v1010_v42, %v718_v1 }
 0x1cd   :  { %v1315_v44 = vpop.f32.mrf.mxu0 }
 0x1ce   :  { %v1337_v45 = vpop.eup %1336  ;;  %v1086_v47 = vadd.f32 %v1076_v41, %v1018_v43 }
 0x1cf   :  { %v1339_v48 = vpop.eup %1338  ;;  %v1115_v53 = vmul.f32 %v1337_v45, %v1111_v46 }
 0x1d0   :  { %v1341_v49 = vpop.eup %1340  ;;  %v1159_v51 = vmul.f32 -1.442695, %v1086_v47 }
 0x1d1   :  { %v1343_v52 = vpop.eup %1342  ;;  %v1114_v54 = vmul.f32 %v1341_v49, %v1339_v48 }
 0x1d2   :  { %1344 = vpow2.f32 %v1159_v51  ;;  %v1117_v55 = vmul.f32 %v1343_v52, %v1112_v50 }
 0x1d3   :  { %v1116_v56 = vadd.f32 %v1115_v53, %v1114_v54 }
 0x1d5   :  { %v1118_v57 = vadd.f32 %v1117_v55, %v1116_v56 }
 0x1d7   :  { %1122 = vst [vmem:[#allocation18] sm:$0xff] %v1118_v57 }
 0x1d8   :  { %1521 = shalt.err (!%p1518_p2)
}
 0x1d9   :  { %1142 = dma.vmem_to_hbm [thread:$0]  %s1140_s1, 128, %s1755_s10, [#allocation19]   ;;  %1346 = vtanh.f32 %v1118_v57 }
 0x1da   :  { %s1577_s11 = smov [#allocation17]  }
 0x1db   :  { %s1129_s12 = sshll.u32 %s1577_s11, 4  ;;  %s1130_s12 = int_to_ptr.vmem [resolvable:$true] %s1129_s12 }
 0x1dc   :  { %s1530_s13 = scalar_lea.vmem %s1130_s12, 128  ;;  %p1535_p4 = scmp.lt.s32.totalorder %s1130_s12, %s1130_s12 }
 0x1dd   :  { %p1531_p3 = scmp.ne.s32.totalorder %s1130_s12, %s1530_s13  ;;  %p1536_p5 = scmp.lt.s32.totalorder %s1530_s13, %s1530_s13 }
 0x1df   :  { %v1345_v58 = vpop.eup %1344  ;;  %p1537_p6 = por %p1536_p5, %p1535_p4 }
 0x1e0   :  { %v1102_v59 = vadd.f32 1.0, %v1345_v58 }
 0x1e1   :  { %p1538_p7 = pnand %p1537_p6, %p1531_p3 }
 0x1e2   :  { %1348 = vrcp.f32 %v1102_v59 }
 0x1e6   :  { %v1347_v60 = vpop.eup %1346 }
 0x1ef   :  { %v1349_v61 = vpop.eup %1348 }
 0x1f0   :  { %v1120_v62 = vmul.f32 %v1349_v61, %v1347_v60 }
 0x1f2   :  { %1121 = vst [vmem:[#allocation17] sm:$0xff] %v1120_v62 }
 0x1f3   :  { %1541 = shalt.err (!%p1538_p7)
}
 0x1f4   :  { %1132 = dma.vmem_to_hbm [thread:$0]  %s1130_s12, 128, %s1754_s9, [#allocation5]  }
 0x1f5   :  { %1560 = dma.done.wait [#allocation5], 128  }
 0x1f6   :  { %1561 = vsyncadd [#allocation5], 4294967168 }
 0x1f7   :  { %1562 = dma.done.wait [#allocation19], 128  }
 0x1f8   :  { %1563 = vsyncadd [#allocation19], 4294967168 }
 0x1f9   :  { %1149 = vsyncpa [#allocation4], 1 }
 0x1fa   :  { %1150 = vsyncpa [#allocation7], 1 }
 0x1fb   :  { %1151 = vsyncpa [#allocation10], 1 }
 0x1fc   :  { %1152 = vsyncpa [#allocation13], 1 }
 0x1fd   :  { %1153 = vsyncpa [#allocation16], 1 }
 0x1fe   :  { %1154 = vsyncpa [#allocation5], 1 }
 0x1ff   :  { %1155 = vsyncpa [#allocation19], 1 }

</bundles_post_ra>
